<compile_context>
chip_gen: v6e
topology: v6e:2x2x1
jax: 0.10.0
libtpu: 0.0.40
codegen_flags: <defaults>
</compile_context>

<pallas_src>
import functools

import jax
import jax.numpy as jnp
from jax.experimental import pallas as pl
from jax.experimental.pallas import tpu as pltpu

MARGIN = 1.0
_LANE_N = 1024   # lane-dense re-layout width (multiple of 128)
_TILE_M = 1024   # target row-block size
_TILE_N = 1024   # target col-block size


def _num_tc_splits():
    """2-way megacore split on v7x (2 TensorCores/chip); 1 on v5e/v6e."""
    try:
        kind = jax.devices()[0].device_kind.lower()
    except Exception:  # defensive: never fail the wrapper over a device query
        return 1
    return 2 if ("v7" in kind or "7x" in kind) else 1


def _hinge_kernel(x_ref, t_ref, o_ref, acc_ref, *, margin, true_m, true_n,
                  tile_m, tile_n, blocks_m, blocks_m_per_split, fold,
                  mask_rows, mask_cols):
    c = pl.program_id(0)              # core-split axis ("parallel")
    i = pl.program_id(1)              # row-block axis ("arbitrary")
    j = pl.program_id(2)              # col-block axis ("arbitrary")
    rb = c * blocks_m_per_split + i   # global row-block index (never clamped)

    @pl.when((i == 0) & (j == 0))
    def _():
        acc_ref[...] = jnp.zeros_like(acc_ref)

    # Stream native dtype from HBM; cast on the VPU inside the kernel.
    xv = x_ref[...].astype(jnp.float32)
    tv = t_ref[...].astype(jnp.float32)
    hinge = jnp.maximum(margin - xv * tv, 0.0)

    def accumulate(vals):
        if fold:
            # Layout-preserving sublane-group fold into (8, tile_n): pure VALU
            # adds, no XLU, tiny scratch traffic.
            acc_ref[...] += vals.reshape(tile_m // 8, 8, tile_n).sum(axis=0)
        else:
            acc_ref[...] += vals

    # Only the last row/col blocks can be partial; everything else takes the
    # mask-free fast path.  These checks fold away entirely (Python-level) when
    # the array tiles exactly.
    partial_terms = []
    if mask_rows:
        partial_terms.append(rb == blocks_m - 1)
    if mask_cols:
        partial_terms.append(j == pl.num_programs(2) - 1)

    if not partial_terms:
        accumulate(hinge)
    else:
        is_partial = functools.reduce(jnp.logical_or, partial_terms)

        @pl.when(jnp.logical_not(is_partial))
        def _():
            accumulate(hinge)

        @pl.when(is_partial)
        def _():
            # Cheap 1-D masks, broadcast inside the select.
            valid = None
            if mask_rows:
                rows = rb * tile_m + jax.lax.broadcasted_iota(
                    jnp.int32, (tile_m, 1), 0)
                valid = rows < true_m
            if mask_cols:
                cols = j * tile_n + jax.lax.broadcasted_iota(
                    jnp.int32, (1, tile_n), 1)
                cvalid = cols < true_n
                valid = cvalid if valid is None else (valid & cvalid)
            accumulate(jnp.where(valid, hinge, 0.0))

    @pl.when((i == pl.num_programs(1) - 1) & (j == pl.num_programs(2) - 1))
    def _():
        # One cross-lane reduction per core split, at the very end.
        o_ref[...] = jnp.broadcast_to(jnp.sum(acc_ref[...]), o_ref.shape)


def _hinge_sum_pallas(x2, t2, margin):
    """sum(relu(margin - x2*t2)) over a 2-D array, via a Pallas kernel."""
    M, N = x2.shape
    assert M < 2**31 and N < 2**31  # iota / index arithmetic is int32

    tile_m = _TILE_M if M > _TILE_M else M
    tile_n = _TILE_N if N > _TILE_N else N
    blocks_m = pl.cdiv(M, tile_m)
    blocks_n = pl.cdiv(N, tile_n)

    # Megacore split (v7x only).  Only split when the row-block count divides
    # evenly, so no clamped duplicate block is ever re-DMA'd from HBM and both
    # TensorCores get equal work.
    num_splits = _num_tc_splits()
    if num_splits > 1 and (blocks_m < num_splits or blocks_m % num_splits):
        num_splits = 1
    blocks_m_per_split = blocks_m // num_splits
    grid = (num_splits, blocks_m_per_split, blocks_n)

    fold = (tile_m % 8 == 0)
    acc_shape = (8, tile_n) if fold else (tile_m, tile_n)

    kernel = functools.partial(
        _hinge_kernel, margin=margin, true_m=M, true_n=N,
        tile_m=tile_m, tile_n=tile_n, blocks_m=blocks_m,
        blocks_m_per_split=blocks_m_per_split, fold=fold,
        mask_rows=(M % tile_m != 0), mask_cols=(N % tile_n != 0))

    def in_map(c, i, j):
        return (c * blocks_m_per_split + i, j)

    out = pl.pallas_call(
        kernel,
        out_shape=jax.ShapeDtypeStruct((num_splits, 8, 128), jnp.float32),
        grid_spec=pltpu.PrefetchScalarGridSpec(
            num_scalar_prefetch=0,
            grid=grid,
            in_specs=[
                # TODO(synk): optionally sweep pipeline_mode=pl.Buffered(3).
                pl.BlockSpec((tile_m, tile_n), in_map),
                pl.BlockSpec((tile_m, tile_n), in_map),
            ],
            out_specs=pl.BlockSpec((1, 8, 128), lambda c, i, j: (c, 0, 0)),
            scratch_shapes=[pltpu.VMEM(acc_shape, jnp.float32)],
        ),
        compiler_params=pltpu.CompilerParams(
            dimension_semantics=("parallel", "arbitrary", "arbitrary"),
            vmem_limit_bytes=32 * 1024 * 1024,
        ),
    )(x2, t2)

    return jnp.sum(out[:, 0, 0])


def hinge_loss(x, t, *, margin=MARGIN, min_pallas_elems=32768):
    """relu(margin - x*t).mean() over all elements (HingeLoss.forward)."""
    assert x.shape == t.shape
    n_elems = x.size
    assert n_elems > 0

    if n_elems < min_pallas_elems:
        # Tiny inputs: launch + per-step grid overhead dominates; plain jnp.
        xf = x.astype(jnp.float32)
        tf = t.astype(jnp.float32)
        return jnp.mean(jnp.maximum(margin - xf * tf, 0.0))

    tail_sum = jnp.float32(0.0)
    if x.ndim >= 2 and x.shape[-1] % 128 == 0:
        # Trailing dim already lane-dense: free reshape to 2-D.
        x2 = x.reshape(-1, x.shape[-1])
        t2 = t.reshape(-1, t.shape[-1])
    else:
        # Lane-sparse trailing dim (e.g. 10 classes): flatten and re-lay out as
        # (rows, _LANE_N) so every vreg / DMA burst is full.  The <_LANE_N flat
        # tail is folded in with plain jnp (negligible work).
        xf = x.reshape(-1)
        tf = t.reshape(-1)
        n_bulk = (n_elems // _LANE_N) * _LANE_N
        if n_bulk == 0:
            x2 = xf.reshape(1, n_elems)
            t2 = tf.reshape(1, n_elems)
        else:
            x2 = xf[:n_bulk].reshape(-1, _LANE_N)
            t2 = tf[:n_bulk].reshape(-1, _LANE_N)
            if n_bulk != n_elems:
                xt = xf[n_bulk:].astype(jnp.float32)
                tt = tf[n_bulk:].astype(jnp.float32)
                tail_sum = jnp.sum(jnp.maximum(margin - xt * tt, 0.0))

    total = _hinge_sum_pallas(x2, t2, margin) + tail_sum
    return total / n_elems


if __name__ == "__main__":
    key = jax.random.PRNGKey(0)

    def reference(x, t, margin=MARGIN):
        xf = x.astype(jnp.float32)
        tf = t.astype(jnp.float32)
        return jnp.mean(jnp.maximum(margin - xf * tf, 0.0))

    cases = [
        ((2, 10), jnp.float32),      # canonical tiny hinge input (batch=2, classes=10)
        ((256, 512), jnp.float32),   # lane-dense trailing dim, single full block
        ((64, 1000), jnp.bfloat16),  # lane-sparse -> flattened to (., 1024) + jnp tail
        ((1100, 384), jnp.float32),  # partial row block -> masked slow path + fold
    ]

    for shape, dtype in cases:
        key, kx, kt = jax.random.split(key, 3)
        x = jax.random.normal(kx, shape, dtype=jnp.float32).astype(dtype)
        t = jnp.where(jax.random.bernoulli(kt, 0.5, shape), 1.0, -1.0).astype(dtype)

        # min_pallas_elems=0 forces the Pallas path even for tiny demo shapes.
        loss = hinge_loss(x, t, min_pallas_elems=0)
        jax.block_until_ready(loss)

        ref = reference(x, t)
        assert jnp.allclose(loss, ref, atol=1e-5, rtol=1e-5), (shape, dtype, loss, ref)

    print("KERNEL_OK")
</pallas_src>

<mosaic_0001>
module attributes {stable_mosaic.version = 11 : i64} {
  func.func @_hinge_kernel(%arg0: i32, %arg1: i32, %arg2: i32, %arg3: memref<1x20xf32, #tpu.memory_space<vmem>>, %arg4: memref<1x20xf32, #tpu.memory_space<vmem>>, %arg5: memref<1x8x128xf32, #tpu.memory_space<vmem>>, %arg6: memref<1x20xf32, #tpu.memory_space<vmem>>) attributes {dimension_semantics = [#tpu.dimension_semantics<parallel>, #tpu.dimension_semantics<arbitrary>, #tpu.dimension_semantics<arbitrary>], iteration_bounds = array<i64: 1, 1, 1>, scalar_prefetch = 0 : i64, scratch_operands = 1 : i64, tpu.core_type = #tpu.core_type<tc>, window_params = [{transform_indices = @transform_0, window_bounds = array<i64: 1, 20>}, {transform_indices = @transform_1, window_bounds = array<i64: 1, 20>}, {transform_indices = @transform_2, window_bounds = array<i64: 1, 8, 128>}]} {
    %c0_i32 = arith.constant 0 : i32
    %0 = arith.cmpi eq, %arg1, %c0_i32 : i32
    %c0_i32_0 = arith.constant 0 : i32
    %1 = arith.cmpi eq, %arg2, %c0_i32_0 : i32
    %2 = arith.andi %0, %1 : i1
    %3 = arith.extui %2 : i1 to i32
    %c0_i32_1 = arith.constant 0 : i32
    %4 = arith.cmpi ne, %3, %c0_i32_1 : i32
    scf.if %4 {
      %cst_13 = arith.constant 0.000000e+00 : f32
      %20 = vector.broadcast %cst_13 : f32 to vector<1x20xf32>
      %c0_14 = arith.constant 0 : index
      %c0_15 = arith.constant 0 : index
      %21 = vector.load %arg6[%c0_14, %c0_15] : memref<1x20xf32, #tpu.memory_space<vmem>>, vector<1x20xf32>
      tpu.vector_store %arg6[%c0_14, %c0_15], %20 {strides = array<i32>} : memref<1x20xf32, #tpu.memory_space<vmem>>, vector<1x20xf32>,
    } else {
    }
    %c0 = arith.constant 0 : index
    %c0_2 = arith.constant 0 : index
    %5 = vector.load %arg3[%c0, %c0_2] : memref<1x20xf32, #tpu.memory_space<vmem>>, vector<1x20xf32>
    %c0_3 = arith.constant 0 : index
    %c0_4 = arith.constant 0 : index
    %6 = vector.load %arg4[%c0_3, %c0_4] : memref<1x20xf32, #tpu.memory_space<vmem>>, vector<1x20xf32>
    %7 = arith.mulf %5, %6 : vector<1x20xf32>
    %cst = arith.constant 1.000000e+00 : f32
    %8 = vector.broadcast %cst : f32 to vector<1x20xf32>
    %9 = arith.subf %8, %7 : vector<1x20xf32>
    %cst_5 = arith.constant 0.000000e+00 : f32
    %10 = vector.broadcast %cst_5 : f32 to vector<1x20xf32>
    %11 = arith.maximumf %9, %10 : vector<1x20xf32>
    %c0_6 = arith.constant 0 : index
    %c0_7 = arith.constant 0 : index
    %12 = vector.load %arg6[%c0_6, %c0_7] : memref<1x20xf32, #tpu.memory_space<vmem>>, vector<1x20xf32>
    %13 = arith.addf %12, %11 : vector<1x20xf32>
    %c0_8 = arith.constant 0 : index
    %c0_9 = arith.constant 0 : index
    %14 = vector.load %arg6[%c0_8, %c0_9] : memref<1x20xf32, #tpu.memory_space<vmem>>, vector<1x20xf32>
    tpu.vector_store %arg6[%c0_8, %c0_9], %13 {strides = array<i32>} : memref<1x20xf32, #tpu.memory_space<vmem>>, vector<1x20xf32>,
    %c0_i32_10 = arith.constant 0 : i32
    %15 = arith.cmpi eq, %arg1, %c0_i32_10 : i32
    %c0_i32_11 = arith.constant 0 : i32
    %16 = arith.cmpi eq, %arg2, %c0_i32_11 : i32
    %17 = arith.andi %15, %16 : i1
    %18 = arith.extui %17 : i1 to i32
    %c0_i32_12 = arith.constant 0 : i32
    %19 = arith.cmpi ne, %18, %c0_i32_12 : i32
    scf.if %19 {
      %c0_13 = arith.constant 0 : index
      %c0_14 = arith.constant 0 : index
      %20 = vector.load %arg6[%c0_13, %c0_14] : memref<1x20xf32, #tpu.memory_space<vmem>>, vector<1x20xf32>
      %21 = vector.shape_cast %20 : vector<1x20xf32> to vector<1x1x20xf32>
      %cst_15 = arith.constant dense<0.000000e+00> : vector<1xf32>
      %22 = vector.multi_reduction <add>, %21, %cst_15 [1, 2] : vector<1x1x20xf32> to vector<1xf32>
      %23 = vector.shape_cast %22 : vector<1xf32> to vector<1x1x1xf32>
      %24 = vector.extract %23[0, 0, 0] : f32 from vector<1x1x1xf32>
      %25 = vector.broadcast %24 : f32 to vector<1x8x128xf32>
      %c0_16 = arith.constant 0 : index
      %c0_17 = arith.constant 0 : index
      %c0_18 = arith.constant 0 : index
      %26 = vector.load %arg5[%c0_16, %c0_17, %c0_18] : memref<1x8x128xf32, #tpu.memory_space<vmem>>, vector<1x8x128xf32>
      tpu.vector_store %arg5[%c0_16, %c0_17, %c0_18], %25 {strides = array<i32>} : memref<1x8x128xf32, #tpu.memory_space<vmem>>, vector<1x8x128xf32>,
    } else {
    }
    return
  }
  func.func @transform_0(%arg0: i32, %arg1: i32, %arg2: i32) -> (i32, i32) {
    %c1_i32 = arith.constant 1 : i32
    %0 = arith.muli %arg0, %c1_i32 : i32
    %1 = arith.addi %0, %arg1 : i32
    %c0_i32 = arith.constant 0 : i32
    return %1, %arg2 : i32, i32
  }
  func.func @transform_1(%arg0: i32, %arg1: i32, %arg2: i32) -> (i32, i32) {
    %c1_i32 = arith.constant 1 : i32
    %0 = arith.muli %arg0, %c1_i32 : i32
    %1 = arith.addi %0, %arg1 : i32
    %c0_i32 = arith.constant 0 : i32
    return %1, %arg2 : i32, i32
  }
  func.func @transform_2(%arg0: i32, %arg1: i32, %arg2: i32) -> (i32, i32, i32) {
    %c0_i32 = arith.constant 0 : i32
    %c0_i32_0 = arith.constant 0 : i32
    %c0_i32_1 = arith.constant 0 : i32
    return %arg0, %c0_i32, %c0_i32_0 : i32, i32, i32
  }
}

</mosaic_0001>

<bundles_post_ra>
// kernel: tpu_custom_call.1
= control target key start
LH: loop header
LB: loop body
LE: loop exit
PB: predicated region body
PF: predicated region fallthrough
CT: control target
= control target key end

     0   :  { %7 = vsyncpa [#allocation4], 0  ;;  %s168_s0 = inlined_call_operand.hbm [shape: f32[1,20], index: 0, kind: input, shape index: {}]   ;;  %s169_s1 = inlined_call_operand.vmem [shape: f32[1,20], index: 1, kind: input, shape index: {}]   ;;  %s170_s2 = inlined_call_operand.hbm [shape: f32[1,8,128], index: 2, kind: output, shape index: {}]  }
   0x1   :  { %8 = vsyncpa [#allocation5], 0  ;;  %s141_s9 = smov [#allocation3]  }
   0x2   :  { %s18_s10 = sshll.u32 %s141_s9, 4  ;;  %s19_s10 = int_to_ptr.vmem [resolvable:$true] %s18_s10 }
   0x3   :  { %s105_s11 = scalar_lea.vmem %s19_s10, 16  ;;  %s109_s12 = scalar_lea.vmem %s19_s10, 32 }
   0x4   :  { %p106_p0 = scmp.ne.s32.totalorder %s19_s10, %s105_s11  ;;  %p110_p1 = scmp.lt.s32.totalorder %s19_s10, %s19_s10 }
   0x5   :  { %p111_p2 = scmp.lt.s32.totalorder %s109_s12, %s105_s11 }
   0x7   :  { %p112_p3 = por %p111_p2, %p110_p1 }
   0x9   :  { %p113_p4 = pnand %p112_p3, %p106_p0 }
   0xb   :  { %116 = shalt.err (!%p113_p4)
}
   0xc   :  { %21 = dma.hbm_to_vmem [thread:$0]  %s168_s0, 16, %s19_s10, [#allocation4]  }
   0xd   :  { %137 = dma.done.wait [#allocation4], 16  }
   0xe   :  { %138 = vsyncadd [#allocation4], 4294967280  ;;  %vm48_vm0 = vcmask 155648   ;;  %v142_v0 = vmov 0.0   ;;  %v50_v1 = vld [vmem:[#allocation3] sm:$0x1] }
   0xf   :  { %49 = vst.msk [vmem:[#allocation2] sm:$0x1] %vm48_vm0, %v142_v0  ;;  %v51_v2 = vld [vmem:[%s169_s1] sm:$0x1]  ;;  %s143_s0 = smov [#allocation6]  }
  0x10   :  { %v52_v3 = vmul.f32 %v51_v2, %v50_v1  ;;  %s80_s17 = sshll.u32 %s143_s0, 4  ;;  %s81_s17 = int_to_ptr.vmem [resolvable:$true] %s80_s17 }
  0x11   :  { %s117_s18 = scalar_lea.vmem %s81_s17, 128  ;;  %p122_p6 = scmp.lt.s32.totalorder %s81_s17, %s81_s17 }
  0x12   :  { %v53_v4 = vsub.f32 1.0, %v52_v3  ;;  %p118_p5 = scmp.ne.s32.totalorder %s81_s17, %s117_s18  ;;  %p123_p7 = scmp.lt.s32.totalorder %s117_s18, %s117_s18 }
  0x14   :  { %v54_v6 = vmax.f32 %v53_v4, 0.0  ;;  %p124_p8 = por %p123_p7, %p122_p6 }
  0x16   :  { %v55_v5 = vld [vmem:[#allocation2] sm:$0x1]  ;;  %p125_p9 = pnand %p124_p8, %p118_p5 }
  0x17   :  { %v56_v7 = vadd.f32 %v55_v5, %v54_v6 }
  0x19   :  { %58 = vst.msk [vmem:[#allocation2] sm:$0x1] %vm48_vm0, %v56_v7 }
  0x20   :  { %v61_v8 = vld [vmem:[#allocation2] sm:$0x1] }
  0x21   :  { %v62_v9 = vsel %vm48_vm0, %v61_v8, 0.0 }
  0x22   :  { %63 = vadd.xlane.f32.xlu0 %v62_v9 }
  0xab   :  { %v64_v10 = vpop.xlane.xlu0 %63 }
  0xac   :  { %v65_v11 = vrot.slane %v64_v10, 4 }
  0xae   :  { %v66_v12 = vadd.f32 %v65_v11, %v64_v10 }
  0xb0   :  { %v67_v13 = vrot.slane %v66_v12, 2 }
  0xb2   :  { %v68_v14 = vadd.f32 %v67_v13, %v66_v12 }
  0xb4   :  { %v69_v15 = vrot.slane %v68_v14, 1 }
  0xb6   :  { %v70_v16 = vadd.f32 %v69_v15, %v68_v14 }
  0xb8   :  { %92 = vpush %v70_v16 }
  0xe9   :  { %s93_s1 = spop %92 }
  0xea   :  { %v72_v17 = vstv %s93_s1 }
  0xeb   :  { %73 = vst [vmem:[#allocation6] sm:$0xff] %v72_v17 }
  0xec   :  { %128 = shalt.err (!%p125_p9)
}
  0xed   :  { %83 = dma.vmem_to_hbm [thread:$0]  %s81_s17, 128, %s170_s2, [#allocation5]  }
  0xee   :  { %139 = dma.done.wait [#allocation5], 128  }
  0xef   :  { %140 = vsyncadd [#allocation5], 4294967168 }
  0xf0   :  { %87 = vsyncpa [#allocation4], 1 }
  0xf1   :  { %88 = vsyncpa [#allocation5], 1 }

</bundles_post_ra>
